<compile_context>
chip_gen: v7x
topology: tpu7x:2x2x1
jax: 0.10.0
libtpu: 0.0.40
codegen_flags: <defaults>
</compile_context>

<pallas_src>
import functools

import jax
import jax.numpy as jnp
from jax.experimental import pallas as pl
from jax.experimental.pallas import tpu as pltpu


def _sublane_pack(itemsize: int) -> int:
    # f32 -> 8 sublanes per vreg row-group, bf16 -> 16, int8/fp8 -> 32.
    return max(8, 32 // max(1, itemsize))


def _vmem_plan():
    """(working-set budget, scoped vmem limit) sized from the chip's VMEM."""
    try:
        cap = int(getattr(pltpu.get_tpu_info(), "vmem_capacity_bytes",
                          128 * 1024 * 1024))
    except Exception:  # pragma: no cover - defensive fallback off-TPU
        cap = 128 * 1024 * 1024
    # ~30% of per-TC VMEM for the double-buffered working set, capped at
    # 32 MiB (v5e/v6e); on v7x (64 MiB/TC) this yields ~19 MiB.
    budget = min(int(0.30 * cap), 32 * 1024 * 1024)
    vmem_limit = min(int(1.6 * budget), int(0.70 * cap))
    return budget, vmem_limit


def _balance_grid(cb, C, B, pack, per_ch_hbm_bytes, steps_mult=1,
                  target_steps=8, min_step_bytes=4 * 1024 * 1024):
    """Shrink the channel block (keeping it a pack multiple) until the grid
    has enough steps for v7x's two TensorCores to share the work, but never
    below ~4 MiB of HBM traffic per step (per-step overhead would show)."""
    while cb > pack and B * pl.cdiv(C, cb) * steps_mult < target_steps:
        new_cb = max(pack, ((cb // 2) // pack) * pack)
        if (new_cb >= cb
                or new_cb * per_ch_hbm_bytes < min_step_bytes
                or pl.cdiv(C, new_cb) == pl.cdiv(C, cb)):
            break
        cb = new_cb
    return cb


def _plan(B, C, hw, factor, itemsize, budget):
    """Pick (mode, channel-block).  mode 'fused': one grid step writes all
    `factor` replicas of a channel slab.  mode 'split': extra innermost grid
    axis over `factor` (input tile not re-DMA'd), for small-C / huge-HW."""
    pack = _sublane_pack(itemsize)

    def legal_cb(cb_max):
        if cb_max >= C:
            return C                      # full-dim block: always layout-legal
        return (cb_max // pack) * pack    # 0 => does not fit

    # fused: double-buffered footprint 2*(1+factor)*cb*hw*itemsize
    cb_fused = legal_cb(budget // (2 * (1 + factor) * hw * itemsize))
    # split: footprint 2*2*cb*hw*itemsize; needs lane block hw % 128 == 0
    cb_split = legal_cb(budget // (4 * hw * itemsize)) if hw % 128 == 0 else 0

    if cb_fused > 0:
        cb = _balance_grid(cb_fused, C, B, pack, (1 + factor) * hw * itemsize)
        return "fused", cb
    if cb_split > 0:
        cb = _balance_grid(cb_split, C, B, pack, 2 * hw * itemsize,
                           steps_mult=factor)
        return "split", cb
    # TODO(synk): add an H*W block axis for the pathological tiny-C / huge-HW
    # regime where even one sublane pack of channels does not fit VMEM.
    return "fused", C


def _repeat_fused_kernel(x_ref, o_ref, *, factor, hw):
    # x_ref: (1, cb, hw)          o_ref: (1, cb, factor*hw)
    # Re-read the input slab from VMEM for every replica (vld slots have ~3x
    # headroom over HBM write BW on all generations), keeping live vregs ~1-2
    # instead of holding the whole block in registers.
    for r in range(factor):
        o_ref[:, :, r * hw:(r + 1) * hw] = x_ref[...]


def _repeat_split_kernel(x_ref, o_ref):
    # x_ref: (1, cb, hw)          o_ref: (1, cb, hw)  (replica slab r)
    o_ref[...] = x_ref[...]


@functools.partial(jax.jit, static_argnames=("factor",))
def upsampling_eoe(inputs: jax.Array, factor: int) -> jax.Array:
    """Pallas equivalent of torch.repeat_interleave(inputs, factor, dim=1)."""
    B, C, H, W = inputs.shape
    hw = H * W
    itemsize = jnp.dtype(inputs.dtype).itemsize

    budget, vmem_limit = _vmem_plan()
    mode, cb = _plan(B, C, hw, factor, itemsize, budget)
    num_cb = pl.cdiv(C, cb)

    x = inputs.reshape(B, C, hw)  # free view for contiguous NCHW
    out_shape = jax.ShapeDtypeStruct((B, C, factor * hw), inputs.dtype)
    cost = pl.CostEstimate(
        flops=0, transcendentals=0,
        bytes_accessed=int((1 + factor) * B * C * hw * itemsize))

    if mode == "fused":
        grid = (B, num_cb)
        in_specs = [pl.BlockSpec((1, cb, hw), lambda b, c: (b, c, 0))]
        out_spec = pl.BlockSpec((1, cb, factor * hw), lambda b, c: (b, c, 0))
        kernel = functools.partial(_repeat_fused_kernel, factor=factor, hw=hw)
        dim_sem = ("parallel", "parallel")
    else:  # "split": innermost axis over replicas; input index ignores r
        grid = (B, num_cb, factor)
        in_specs = [pl.BlockSpec((1, cb, hw), lambda b, c, r: (b, c, 0))]
        out_spec = pl.BlockSpec((1, cb, hw), lambda b, c, r: (b, c, r))
        kernel = _repeat_split_kernel
        dim_sem = ("parallel", "parallel", "arbitrary")

    out3d = pl.pallas_call(
        kernel,
        out_shape=out_shape,
        grid_spec=pltpu.PrefetchScalarGridSpec(
            num_scalar_prefetch=0,
            grid=grid,
            in_specs=in_specs,
            out_specs=out_spec,
        ),
        compiler_params=pltpu.CompilerParams(
            dimension_semantics=dim_sem,
            vmem_limit_bytes=vmem_limit,
        ),
        cost_estimate=cost,
    )(x)

    # (B, C, factor*H*W) -> (B, C*factor, H, W): contiguous reinterpretation,
    # giving out[b, c*factor + r, h, w] == in[b, c, h, w].
    return out3d.reshape(B, C * factor, H, W)


def _reference(inputs: jax.Array, factor: int) -> jax.Array:
    # Pure-JAX reference for torch.repeat_interleave(inputs, factor, dim=1).
    return jnp.repeat(inputs, factor, axis=1)


if __name__ == "__main__":
    # Upsampling_EOE has no learnable parameters; only the `factor` hyperparam.
    factor = 3
    B, C, H, W = 2, 4, 16, 16

    key = jax.random.PRNGKey(0)
    x = jax.random.normal(key, (B, C, H, W), dtype=jnp.float32)

    out = upsampling_eoe(x, factor)
    out = jax.block_until_ready(out)

    ref = _reference(x, factor)
    assert out.shape == (B, C * factor, H, W), out.shape
    assert out.dtype == x.dtype, out.dtype
    assert jnp.array_equal(out, ref), "mismatch vs reference repeat_interleave"

    print("KERNEL_OK")
</pallas_src>

<mosaic_0001>
module attributes {stable_mosaic.version = 11 : i64} {
  func.func @_repeat_fused_kernel(%arg0: i32, %arg1: i32, %arg2: memref<1x4x256xf32, #tpu.memory_space<vmem>>, %arg3: memref<1x4x768xf32, #tpu.memory_space<vmem>>) attributes {dimension_semantics = [#tpu.dimension_semantics<parallel>, #tpu.dimension_semantics<parallel>], iteration_bounds = array<i64: 2, 1>, scalar_prefetch = 0 : i64, scratch_operands = 0 : i64, tpu.core_type = #tpu.core_type<tc>, window_params = [{transform_indices = @transform_0, window_bounds = array<i64: 1, 4, 256>}, {transform_indices = @transform_1, window_bounds = array<i64: 1, 4, 768>}]} {
    %c0 = arith.constant 0 : index
    %c0_0 = arith.constant 0 : index
    %c0_1 = arith.constant 0 : index
    %0 = vector.load %arg2[%c0, %c0_0, %c0_1] : memref<1x4x256xf32, #tpu.memory_space<vmem>>, vector<1x4x256xf32>
    %c0_2 = arith.constant 0 : index
    %c0_3 = arith.constant 0 : index
    %c0_4 = arith.constant 0 : index
    %1 = vector.load %arg3[%c0_2, %c0_3, %c0_4] : memref<1x4x768xf32, #tpu.memory_space<vmem>>, vector<1x4x256xf32>
    tpu.vector_store %arg3[%c0_2, %c0_3, %c0_4], %0 {strides = array<i32>} : memref<1x4x768xf32, #tpu.memory_space<vmem>>, vector<1x4x256xf32>,
    %c0_5 = arith.constant 0 : index
    %c0_6 = arith.constant 0 : index
    %c0_7 = arith.constant 0 : index
    %2 = vector.load %arg2[%c0_5, %c0_6, %c0_7] : memref<1x4x256xf32, #tpu.memory_space<vmem>>, vector<1x4x256xf32>
    %c0_8 = arith.constant 0 : index
    %c0_9 = arith.constant 0 : index
    %c256 = arith.constant 256 : index
    %3 = vector.load %arg3[%c0_8, %c0_9, %c256] : memref<1x4x768xf32, #tpu.memory_space<vmem>>, vector<1x4x256xf32>
    tpu.vector_store %arg3[%c0_8, %c0_9, %c256], %2 {strides = array<i32>} : memref<1x4x768xf32, #tpu.memory_space<vmem>>, vector<1x4x256xf32>,
    %c0_10 = arith.constant 0 : index
    %c0_11 = arith.constant 0 : index
    %c0_12 = arith.constant 0 : index
    %4 = vector.load %arg2[%c0_10, %c0_11, %c0_12] : memref<1x4x256xf32, #tpu.memory_space<vmem>>, vector<1x4x256xf32>
    %c0_13 = arith.constant 0 : index
    %c0_14 = arith.constant 0 : index
    %c512 = arith.constant 512 : index
    %5 = vector.load %arg3[%c0_13, %c0_14, %c512] : memref<1x4x768xf32, #tpu.memory_space<vmem>>, vector<1x4x256xf32>
    tpu.vector_store %arg3[%c0_13, %c0_14, %c512], %4 {strides = array<i32>} : memref<1x4x768xf32, #tpu.memory_space<vmem>>, vector<1x4x256xf32>,
    return
  }
  func.func @transform_0(%arg0: i32, %arg1: i32) -> (i32, i32, i32) {
    %c0_i32 = arith.constant 0 : i32
    %c0_i32_0 = arith.constant 0 : i32
    return %arg0, %arg1, %c0_i32 : i32, i32, i32
  }
  func.func @transform_1(%arg0: i32, %arg1: i32) -> (i32, i32, i32) {
    %c0_i32 = arith.constant 0 : i32
    %c0_i32_0 = arith.constant 0 : i32
    return %arg0, %arg1, %c0_i32 : i32, i32, i32
  }
}

</mosaic_0001>

<bundles_post_ra>
// kernel: upsampling_eoe.1
= control target key start
LH: loop header
LB: loop body
LE: loop exit
PB: predicated region body
PF: predicated region fallthrough
CT: control target
= control target key end

     0   :  { %s321_s6 = smov 0   ;;  %s323_s7 = smov 0   ;;  %s337_s0 = inlined_call_operand.vmem [shape: f32[2,4,256], index: 0, kind: input, shape index: {}]   ;;  %s338_s1 = inlined_call_operand.vmem [shape: f32[2,4,768], index: 1, kind: output, shape index: {}]  }
   0x1   :  { %s307_s8 = smov 0  }
   0x2 LB: > { %s23_s9 = sadd.s32 1, %s305_s7  ;;  %p255_p0 = scmp.ge.s32.totalorder %s309_s8, 1  ;;  %s309_s8 = sphi %s307_s8, %s11_s8   ;;  %s305_s7 = sphi %s323_s7, %s340_s7   ;;  %s301_s6 = sphi %s321_s6, %s339_s6  }
   0x3   : > { %p25_p1 = scmp.ge.s32.totalorder %s23_s9, 2  ;;  %p107_p2 = scmp.lt.s32.totalorder %s309_s8, 3 }
   0x5   : > { %s342_s9 = smov (%p25_p1, %s23_s9), 0  ;;  %p108_p3 = pnand %p255_p0, %p107_p2 }
   0x6   : > { %p135_p4 = scmp.lt.s32.totalorder (!%p108_p3), %s301_s6, 1 }
   0x7   : > { %111 = sbr.rel (%p108_p3) target bundleno = 20 (0x14), region = 24 }
   0xe   : > { %s344_s6 = smov (!%p135_p4, %s301_s6), 1 }
   0xf   : > { %s261_s10 = sshll.u32 %s344_s6, 3  ;;  %s262_s11 = smul.u32 24, %s344_s6 }
  0x10   : > { %s143_s14 = scalar_lea.vmem %s337_s0, %s261_s10 }
  0x11   : > { %s152_s17 = scalar_lea.vmem %s338_s1, %s262_s11  ;;  %v153_v0 = vld [vmem:[%s143_s14] sm:$0xff] }
  0x12   : > { %154 = vst [vmem:[%s152_s17] sm:$0xff] %v153_v0  ;;  %156 = vst [vmem:[%s152_s17 + $0x8] sm:$0xff] %v153_v0 }
  0x13   : > { %158 = vst [vmem:[%s152_s17 + $0x10] sm:$0xff] %v153_v0 }
  0x14 PF: > { %s11_s8 = sadd.s32 1, %s309_s8   ;;  %s339_s6 = smov %s305_s7 }
  0x15   : > { %p8_p5 = scmp.ge.s32.totalorder %s11_s8, 4   ;;  %s340_s7 = smov %s342_s9 }
  0x17   :  { %10 = sbr.rel (!%p8_p5) target bundleno = 2 (0x2), region = 54 }

</bundles_post_ra>
